<compile_context>
chip_gen: v6e
topology: v6e:2x2x1
jax: 0.10.0
libtpu: 0.0.40
codegen_flags: <defaults>
</compile_context>

<pallas_src>
import jax
import jax.numpy as jnp
from jax import lax
from jax.experimental import pallas as pl
from jax.experimental.pallas import tpu as pltpu


def _make_kernel(has_bias: bool, weight_is_dv: bool):
    # "vd": weight tile (vocab_tile, D) -> contract dim 1 of both operands.
    # "dv": weight tile (D, vocab_tile) -> canonical (K, N) RHS, contract (1, 0).
    dn = (((1,), (0,)), ((), ())) if weight_is_dv else (((1,), (1,)), ((), ()))

    if has_bias:
        def kernel(x_ref, w_ref, b_ref, o_ref):
            acc = lax.dot_general(
                x_ref[...], w_ref[...],
                dimension_numbers=dn,
                preferred_element_type=jnp.float32,   # f32 MXU accumulation
            )
            o_ref[...] = (acc + b_ref[...]).astype(o_ref.dtype)
    else:
        def kernel(x_ref, w_ref, o_ref):
            acc = lax.dot_general(
                x_ref[...], w_ref[...],
                dimension_numbers=dn,
                preferred_element_type=jnp.float32,
            )
            o_ref[...] = acc.astype(o_ref.dtype)
    return kernel


def lm_head_forward(x, weight, bias=None, *, cu_seqlens_q=None, is_prefill=False,
                    vocab_tile=None, out_dtype=None, weight_layout="vd",
                    target_weight_tile_bytes=12 << 20):
    """Pallas implementation of ParallelLMHead.forward (tp_size == 1).

    x:      (num_tokens, hidden)
    weight: (vocab, hidden) for weight_layout="vd" (PyTorch layout), or
            (hidden, vocab) for weight_layout="dv" (pre-transposed).
    bias:   (vocab,) or None
    """
    if is_prefill:
        assert cu_seqlens_q is not None
        last_indices = cu_seqlens_q[1:] - 1
        x = x[last_indices]                      # (num_seqs, hidden) -- glue

    if weight_layout == "vd":
        V, D = weight.shape
    elif weight_layout == "dv":
        D, V = weight.shape
    else:
        raise ValueError(f"unknown weight_layout {weight_layout!r}")

    T, D2 = x.shape
    assert D == D2, (x.shape, weight.shape)
    if out_dtype is None:
        out_dtype = x.dtype

    # The weight is streamed as-is (no per-call cast -- store it pre-cast!).
    # x is tiny: cast it to the weight dtype so the MXU sees matched operands.
    x_c = x.astype(weight.dtype) if x.dtype != weight.dtype else x

    wbytes = jnp.dtype(weight.dtype).itemsize
    xbytes = jnp.dtype(x_c.dtype).itemsize
    obytes = jnp.dtype(out_dtype).itemsize

    # ---- vocab tile: sized by bytes (double-buffered weight tile must fit
    # v7x's 64 MiB VMEM; big contiguous DMAs on v5e/v6e), multiple of 256 lanes.
    if vocab_tile is None:
        lane_mult = 256
        t = target_weight_tile_bytes // max(D * wbytes, 1)
        t = max(lane_mult, (t // lane_mult) * lane_mult)
        if V >= lane_mult:
            t = min(t, (V // lane_mult) * lane_mult)   # never wider than the vocab
        else:
            t = V                                       # tiny vocab: one full block
        vocab_tile = int(t)
    else:
        vocab_tile = int(vocab_tile)
        if V >= 128:
            vocab_tile = max(128, (min(vocab_tile, V) // 128) * 128)
        else:
            vocab_tile = V

    num_tiles = pl.cdiv(V, vocab_tile)          # partial last tile handled by Pallas

    has_bias = bias is not None
    args = [x_c, weight]
    if has_bias:
        args.append(bias.astype(jnp.float32).reshape(1, V))   # tiny

    # ---- specs
    x_spec = pl.BlockSpec((T, D), lambda j: (0, 0))           # resident across grid
    if weight_layout == "vd":
        w_spec = pl.BlockSpec((vocab_tile, D), lambda j: (j, 0))
    else:
        w_spec = pl.BlockSpec((D, vocab_tile), lambda j: (0, j))
    in_specs = [x_spec, w_spec]
    if has_bias:
        in_specs.append(pl.BlockSpec((1, vocab_tile), lambda j: (0, j)))
    out_spec = pl.BlockSpec((T, vocab_tile), lambda j: (0, j))

    # ---- VMEM budget: double-buffered weight/output tiles + resident x (+ bias).
    vmem_needed = (2 * vocab_tile * D * wbytes
                   + 2 * T * D * xbytes
                   + 2 * T * vocab_tile * obytes
                   + (2 * vocab_tile * 4 if has_bias else 0))
    vmem_cap = 48 << 20                                        # conservative fallback
    if hasattr(pltpu, "get_tpu_info"):
        try:
            vmem_cap = int(0.85 * pltpu.get_tpu_info().vmem_capacity_bytes)
        except Exception:
            pass                                               # host-side query only
    vmem_limit = int(min(max(vmem_needed + (8 << 20), 32 << 20), vmem_cap))

    cost = pl.CostEstimate(
        flops=2 * T * V * D,
        transcendentals=0,
        bytes_accessed=V * D * wbytes + T * D * xbytes + T * V * obytes,
    )

    kernel = _make_kernel(has_bias, weight_layout == "dv")

    return pl.pallas_call(
        kernel,
        out_shape=jax.ShapeDtypeStruct((T, V), out_dtype),
        grid_spec=pltpu.PrefetchScalarGridSpec(
            num_scalar_prefetch=0,
            grid=(num_tiles,),
            in_specs=in_specs,
            out_specs=out_spec,
        ),
        compiler_params=pltpu.CompilerParams(
            dimension_semantics=("parallel",),    # vocab tiles shard across TCs (v7x)
            vmem_limit_bytes=vmem_limit,
        ),
        cost_estimate=cost,
    )(*args)


if __name__ == "__main__":
    # Small, deterministic configuration. Vocab deliberately NOT tile-aligned so the
    # partial-last-tile path is exercised (real vocabs like 32000 / 151936 aren't
    # tile-aligned either).
    num_embeddings = 1000     # vocab size (per partition; tp_size == 1)
    embedding_dim = 128       # hidden size
    num_tokens = 16           # total prefill tokens across sequences

    key = jax.random.PRNGKey(0)
    k_w, k_b, k_x = jax.random.split(key, 3)

    weight_f32 = jax.random.normal(k_w, (num_embeddings, embedding_dim), jnp.float32) * 0.02
    bias = jax.random.normal(k_b, (num_embeddings,), jnp.float32) * 0.01
    x = jax.random.normal(k_x, (num_tokens, embedding_dim), jnp.float32)

    # Serving-stack style: the weight is held pre-cast to bf16 ONCE, outside the
    # per-call path (this replaces the old per-call weight.astype()).
    weight = weight_f32.astype(jnp.bfloat16)
    weight_dv = weight.T                      # optional pre-transposed [hidden, vocab] copy

    # prefill context: 3 sequences of lengths 5, 7, 4 -> cu_seqlens_q = [0, 5, 12, 16]
    cu_seqlens_q = jnp.array([0, 5, 12, 16], dtype=jnp.int32)

    # --- prefill path, with bias, explicit vocab_tile (grid = 2, partial last tile) ---
    logits = lm_head_forward(x, weight, bias,
                             cu_seqlens_q=cu_seqlens_q, is_prefill=True,
                             vocab_tile=512)
    logits = jax.block_until_ready(logits)

    # Reference mirrors what the kernel computes numerically (bf16 operands, f32 acc).
    last_indices = cu_seqlens_q[1:] - 1
    x_last = x[last_indices]
    ref = (x_last.astype(jnp.bfloat16).astype(jnp.float32)
           @ weight.astype(jnp.float32).T) + bias

    assert logits.shape == (cu_seqlens_q.shape[0] - 1, num_embeddings), logits.shape
    max_err = float(jnp.max(jnp.abs(logits.astype(jnp.float32) - ref)))
    assert max_err < 5e-3, f"max err {max_err}"

    # Also sanity-check against the pure-f32 PyTorch-equivalent reference.
    ref_f32 = x_last @ weight_f32.T + bias
    assert float(jnp.max(jnp.abs(logits.astype(jnp.float32) - ref_f32))) < 2e-2

    # --- decode-style call: no gather, no bias, auto byte-sized vocab_tile ---
    logits_nb = jax.block_until_ready(
        lm_head_forward(x_last, weight, None, is_prefill=False))
    assert logits_nb.shape == (x_last.shape[0], num_embeddings)
    ref_nb = (x_last.astype(jnp.bfloat16).astype(jnp.float32)
              @ weight.astype(jnp.float32).T)
    assert float(jnp.max(jnp.abs(logits_nb.astype(jnp.float32) - ref_nb))) < 5e-3

    # --- pre-transposed weight layout (canonical (K, N) MXU RHS, no relayout risk) ---
    logits_dv = jax.block_until_ready(
        lm_head_forward(x_last, weight_dv, bias, weight_layout="dv", vocab_tile=512))
    assert logits_dv.shape == (x_last.shape[0], num_embeddings)
    assert float(jnp.max(jnp.abs(logits_dv.astype(jnp.float32) - ref))) < 5e-3

    print("KERNEL_OK")
</pallas_src>

<mosaic_0001>
module attributes {stable_mosaic.version = 11 : i64} {
  func.func @kernel(%arg0: i32, %arg1: memref<3x128xbf16, #tpu.memory_space<vmem>>, %arg2: memref<512x128xbf16, #tpu.memory_space<vmem>>, %arg3: memref<1x512xf32, #tpu.memory_space<vmem>>, %arg4: memref<3x512xf32, #tpu.memory_space<vmem>>) attributes {dimension_semantics = [#tpu.dimension_semantics<parallel>], iteration_bounds = array<i64: 2>, scalar_prefetch = 0 : i64, scratch_operands = 0 : i64, tpu.core_type = #tpu.core_type<tc>, window_params = [{pipeline_mode = #tpu.pipeline_mode<synchronous>, transform_indices = @transform_0, window_bounds = array<i64: 3, 128>}, {transform_indices = @transform_1, window_bounds = array<i64: 512, 128>}, {transform_indices = @transform_2, window_bounds = array<i64: 1, 512>}, {transform_indices = @transform_3, window_bounds = array<i64: 3, 512>}]} {
    %c0 = arith.constant 0 : index
    %c0_0 = arith.constant 0 : index
    %0 = vector.load %arg1[%c0, %c0_0] : memref<3x128xbf16, #tpu.memory_space<vmem>>, vector<3x128xbf16>
    %c0_1 = arith.constant 0 : index
    %c0_2 = arith.constant 0 : index
    %1 = vector.load %arg2[%c0_1, %c0_2] : memref<512x128xbf16, #tpu.memory_space<vmem>>, vector<512x128xbf16>
    %cst = arith.constant dense<0.000000e+00> : vector<3x512xf32>
    %2 = tpu.matmul %0, %1, %cst {dimension_numbers = #tpu.dot_dimension_numbers<[1], [1], [0], [0], [0, 0, 1, 0], [], []>} : vector<3x128xbf16>, vector<512x128xbf16>, vector<3x512xf32> -> vector<3x512xf32>
    %c0_3 = arith.constant 0 : index
    %c0_4 = arith.constant 0 : index
    %3 = vector.load %arg3[%c0_3, %c0_4] : memref<1x512xf32, #tpu.memory_space<vmem>>, vector<1x512xf32>
    %4 = vector.broadcast %3 : vector<1x512xf32> to vector<3x512xf32>
    %5 = arith.addf %2, %4 : vector<3x512xf32>
    %c0_5 = arith.constant 0 : index
    %c0_6 = arith.constant 0 : index
    %6 = vector.load %arg4[%c0_5, %c0_6] : memref<3x512xf32, #tpu.memory_space<vmem>>, vector<3x512xf32>
    tpu.vector_store %arg4[%c0_5, %c0_6], %5 {strides = array<i32>} : memref<3x512xf32, #tpu.memory_space<vmem>>, vector<3x512xf32>,
    return
  }
  func.func @transform_0(%arg0: i32) -> (i32, i32) {
    %c0_i32 = arith.constant 0 : i32
    %c0_i32_0 = arith.constant 0 : i32
    %c0_i32_1 = arith.constant 0 : i32
    return %c0_i32, %c0_i32_0 : i32, i32
  }
  func.func @transform_1(%arg0: i32) -> (i32, i32) {
    %c0_i32 = arith.constant 0 : i32
    %c0_i32_0 = arith.constant 0 : i32
    return %arg0, %c0_i32 : i32, i32
  }
  func.func @transform_2(%arg0: i32) -> (i32, i32) {
    %c0_i32 = arith.constant 0 : i32
    %c0_i32_0 = arith.constant 0 : i32
    return %c0_i32, %arg0 : i32, i32
  }
  func.func @transform_3(%arg0: i32) -> (i32, i32) {
    %c0_i32 = arith.constant 0 : i32
    %c0_i32_0 = arith.constant 0 : i32
    return %c0_i32, %arg0 : i32, i32
  }
}

</mosaic_0001>

<bundles_post_ra>
// kernel: tpu_custom_call.1
= control target key start
LH: loop header
LB: loop body
LE: loop exit
PB: predicated region body
PF: predicated region fallthrough
CT: control target
= control target key end

     0   :  { %8 = vsyncpa [#allocation3], 0  ;;  %s1335_s0 = inlined_call_operand.hbm [shape: bf16[3,128], index: 0, kind: input, shape index: {}]   ;;  %s1336_s1 = inlined_call_operand.hbm [shape: bf16[1000,128], index: 1, kind: input, shape index: {}]   ;;  %s1337_s2 = inlined_call_operand.hbm [shape: f32[1,1000], index: 2, kind: input, shape index: {}]   ;;  %s1338_s3 = inlined_call_operand.hbm [shape: f32[3,1000], index: 3, kind: output, shape index: {}]  }
   0x1   :  { %9 = vsyncpa [#allocation6], 0 }
   0x2   :  { %11 = vsyncpa [#allocation6 + $0x1], 0 }
   0x3   :  { %12 = vsyncpa [#allocation4], 0 }
   0x4   :  { %14 = vsyncpa [#allocation4 + $0x1], 0  ;;  %s1095_s12 = smov 0   ;;  %s1097_s13 = smov 0  }
   0x5   :  { %s1099_s14 = smov 0   ;;  %s1101_s15 = smov 0  }
   0x6 LB: > { %s1116_s16 = sadd.s32 4294967295, %s1067_s15   ;;  %s739_s17 = sadd.s32 4294967294, %s1067_s15   ;;  %s1067_s15 = sphi %s1101_s15, %s1357_s15   ;;  %s1063_s14 = sphi %s1099_s14, %s1356_s14   ;;  %s1059_s13 = sphi %s1097_s13, %s1355_s13   ;;  %s1055_s12 = sphi %s1095_s12, %s1354_s12  }
   0x7   : > { %s1120_s18 = sadd.s32 1, %s1067_s15   ;;  %s48_s19 = sadd.s32 1, %s1063_s14 }
   0x8   : > { %s45_s20 = ssub.s32 %s1067_s15, %s1120_s18  ;;  %p55_p0 = scmp.ne.s32.totalorder %s1063_s14, %s1059_s13 }
   0x9   : > { %p46_p1 = scmp.eq.s32.totalorder %s45_s20, 0  ;;  %p56_p2 = scmp.eq.s32.totalorder %s1067_s15, 0 }
   0xa   : > { %p61_p3 = scmp.ne.s32.totalorder %s1059_s13, %s1055_s12  ;;  %p1342_p4 = scmp.eq.s32.totalorder %s1116_s16, 0 }
   0xb   : > { %s1132_s21 = scalar_select %p46_p1, %s1063_s14, %s48_s19  }
   0xc   : > { %p1134_p5 = por %p56_p2, %p55_p0  ;;  %p1140_p6 = por %p1342_p4, %p61_p3 }
   0xd   : > { %p111_p7 = scmp.eq.s32.totalorder %s1116_s16, 1  ;;  %p117_p8 = scmp.eq.s32.totalorder %s739_s17, 1 }
   0xe   : > { %s1344_s23 = scalar_select %p1140_p6, 1, 0 }
   0xf   : > { %p740_p9 = scmp.ge.s32.totalorder %s1067_s15, 1  ;;  %p124_p10 = scmp.lt.s32.totalorder %s1067_s15, 3 }
  0x10   : > { %p1147_p11 = por %p111_p7, %p55_p0  ;;  %p1151_p12 = por %p117_p8, %p61_p3 }
  0x11   : > { %p1155_p13 = pnand %p740_p9, %p124_p10  ;;  %s1069_s27 = smov [#allocation2]  }
  0x12   : > { %s1345_s24 = scalar_select %p1147_p11, 1, 0 }
  0x13   : > { %s1346_s25 = scalar_select %p1151_p12, 1, 0 }
  0x14   : > { %p843_p1 = pneg %p1155_p13  ;;  %s137_s28 = sshll.u32 %s1069_s27, 4  ;;  %s138_s28 = int_to_ptr.vmem [resolvable:$true] %s137_s28 }
  0x15   : > { %s932_s29 = scalar_lea.vmem %s138_s28, 32  ;;  %p940_p8 = scmp.lt.s32.totalorder %s138_s28, %s138_s28 }
  0x16   : > { %p844_p2 = pnand %p843_p1, %p1342_p4  ;;  %p933_p7 = scmp.ne.s32.totalorder %s138_s28, %s932_s29 }
  0x17   : > { %p941_p6 = scmp.lt.s32.totalorder %s932_s29, %s932_s29 }
  0x18   : > { %p923_p0 = pneg %p844_p2 }
  0x19   : > { %p942_p12 = por %p941_p6, %p940_p8 }
  0x1a   : > { %p935_p11 = pnand %p933_p7, %p923_p0 }
  0x1c   : > { %p936_p3 = pneg %p935_p11 }
  0x1e   : > { %p943_p9 = pnand %p942_p12, %p936_p3 }
  0x20   : > { %946 = shalt.err (!%p943_p9)
}
  0x21   : > { %846 = dma.hbm_to_vmem [thread:$0]  (!%p844_p2), %s1335_s0, 32, %s138_s28, [#allocation3]  }
  0x22   : > { %p1341_p10 = scmp.ge.s32.totalorder %s1067_s15, 2 }
  0x24   : > { %144 = sbr.rel (%p1341_p10) target bundleno = 98 (0x62), region = 20 }
  0x29   : > { %147 = sbr.rel (!%p1134_p5) target bundleno = 73 (0x49), region = 24  ;;  %s148_s5 = sand.u32 (%p1134_p5), 1, %s1067_s15  }
  0x2a   : > { %s150_s6 = sand.u32 (%p1134_p5), 1, %s1063_s14   ;;  %s744_s8 = sshll.u32 (%p1134_p5), %s1067_s15, 6 }
  0x2b   : > { %s743_s7 = sshll.u32 (%p1134_p5), %s150_s6, 8  ;;  %s154_s9 = ssub.s32 (%p1134_p5), 125, %s744_s8 }
  0x2c   : > { %p155_p6 = scmp.lt.s32.totalorder (%p1134_p5), %s154_s9, 64  ;;  %s1177_s17 = scalar_lea.sflag (%p1134_p5), [#allocation6], %s148_s5 }
  0x2d   : > { %s152_s19 = scalar_lea.vmem (%p1134_p5), [#allocation5], %s743_s7 }
  0x2e   : > { %s1359_s9 = smov (!%p155_p6, %s154_s9), 64 }
  0x2f   : > { %s1174_s10 = sshll.u32 %s1359_s9, 6 }
  0x30   : > { %s159_s11 = ssub.s32 4096, %s1174_s10 }
  0x31   : > { %160 = vsyncadd %s1177_s17, %s159_s11  ;;  %p746_p11 = scmp.ne.s32.totalorder %s1174_s10, 0  ;;  %s795_s20 = sshll.u32 %s1067_s15, 12 }
  0x32   : > { %s1185_s29 = scalar_lea.hbm %s1336_s1, %s795_s20  ;;  %s165_s30 = sshll.u32 %s152_s19, 4  ;;  %s1187_s30 = int_to_ptr.vmem [resolvable:$true] %s165_s30 }
  0x33   : > { %s947_s4 = scalar_lea.hbm %s1185_s29, %s1174_s10  ;;  %s951_s7 = scalar_lea.hbm %s1336_s1, 8000 }
  0x34   : > { %p948_p12 = scmp.ne.s32.totalorder %s1185_s29, %s947_s4  ;;  %p952_p0 = scmp.lt.s32.totalorder %s1185_s29, %s1336_s1 }
  0x35   : > { %p953_p7 = scmp.lt.s32.totalorder %s951_s7, %s947_s4 }
  0x36   : > { %p949_p1 = pnand %p948_p12, %p746_p11 }
  0x37   : > { %p954_p3 = por %p953_p7, %p952_p0 }
  0x38   : > { %p950_p2 = pneg %p949_p1 }
  0x3a   : > { %p955_p8 = pnand %p954_p3, %p950_p2 }
  0x3c   : > { %958 = shalt.err (!%p955_p8)
}
  0x3d   : > { %s959_s11 = scalar_lea.vmem %s1187_s30, %s1174_s10  ;;  %s1070_s19 = smov [#allocation5]  }
  0x3e   : > { %p960_p9 = scmp.ne.s32.totalorder %s1187_s30, %s959_s11  ;;  %s963_s20 = sshll.u32 %s1070_s19, 4  ;;  %s964_s20 = int_to_ptr.vmem [resolvable:$false] %s963_s20 }
  0x3f   : > { %s965_s27 = scalar_lea.vmem %s964_s20, 8192  ;;  %p966_p1 = scmp.lt.s32.totalorder %s1187_s30, %s964_s20 }
  0x40   : > { %p961_p6 = pnand %p960_p9, %p746_p11  ;;  %p967_p10 = scmp.lt.s32.totalorder %s965_s27, %s959_s11 }
  0x42   : > { %p962_p12 = pneg %p961_p6  ;;  %p968_p4 = por %p967_p10, %p966_p1 }
  0x44   : > { %p969_p0 = pnand %p968_p4, %p962_p12 }
  0x46   : > { %972 = shalt.err (!%p969_p0)
}
  0x47   : > { %s1071_s28 = smov 64   ;;  %s1072_s4 = smov 4  }
  0x48   : > { %171 = dma.hbm_to_vmem [thread:$0]  (%p746_p11), %s1185_s29, %s1174_s10, %s1187_s30, %s1177_s17, %s1071_s28, %s1071_s28, %s1072_s4  }
  0x49 PF: > { %s175_s5 = sand.u32 1, %s1067_s15   ;;  %s177_s6 = sand.u32 1, %s1063_s14  }
  0x4a   : > { %s750_s7 = sshll.u32 %s177_s6, 2  ;;  %s796_s8 = sshll.u32 %s1067_s15, 6 }
  0x4b   : > { %s1219_s19 = scalar_lea.hbm %s1337_s2, %s796_s8  ;;  %s179_s20 = scalar_lea.vmem [#allocation7], %s750_s7 }
  0x4c   : > { %s187_s27 = sshll.u32 %s179_s20, 4  ;;  %s176_s10 = scalar_lea.sflag [#allocation6], %s175_s5  ;;  %s188_s27 = int_to_ptr.vmem [resolvable:$true] %s187_s27 }
  0x4d   : > { %s973_s17 = scalar_lea.hbm %s1219_s19, 64  ;;  %s977_s28 = scalar_lea.hbm %s1337_s2, 128 }
  0x4e   : > { %p974_p4 = scmp.ne.s32.totalorder %s1219_s19, %s973_s17  ;;  %p978_p2 = scmp.lt.s32.totalorder %s1219_s19, %s1337_s2 }
  0x4f   : > { %p979_p7 = scmp.lt.s32.totalorder %s977_s28, %s973_s17 }
  0x50   : > { %p975_p10 = pnand %p974_p4, %p1134_p5 }
  0x51   : > { %p980_p3 = por %p979_p7, %p978_p2 }
  0x52   : > { %p976_p11 = pneg %p975_p10 }
  0x54   : > { %p981_p8 = pnand %p980_p3, %p976_p11 }
  0x56   : > { %984 = shalt.err (!%p981_p8)
}
  0x57   : > { %s985_s7 = scalar_lea.vmem %s188_s27, 64  ;;  %s1073_s5 = smov [#allocation7]  }
  0x58   : > { %p986_p9 = scmp.ne.s32.totalorder %s188_s27, %s985_s7  ;;  %s989_s8 = sshll.u32 %s1073_s5, 4  ;;  %s990_s8 = int_to_ptr.vmem [resolvable:$false] %s989_s8 }
  0x59   : > { %s991_s9 = scalar_lea.vmem %s990_s8, 128  ;;  %p992_p1 = scmp.lt.s32.totalorder %s188_s27, %s990_s8 }
  0x5a   : > { %p987_p6 = pnand %p986_p9, %p1134_p5  ;;  %p993_p0 = scmp.lt.s32.totalorder %s991_s9, %s985_s7 }
  0x5c   : > { %p988_p12 = pneg %p987_p6  ;;  %p994_p4 = por %p993_p0, %p992_p1 }
  0x5e   : > { %p995_p10 = pnand %p994_p4, %p988_p12 }
  0x60   : > { %998 = shalt.err (!%p995_p10)
}
  0x61   : > { %836 = dma.hbm_to_vmem [thread:$0]  (%p1134_p5), %s1219_s19, 64, %s188_s27, %s176_s10  }
  0x62 PF: > { %196 = sbr.rel (%p1155_p13) target bundleno = 388 (0x184), region = 32  ;;  %p1348_p11 = scmp.eq.s32.totalorder (!%p1155_p13), %s1116_s16, 0 }
  0x67   : > { %1042 = dma.done.wait (%p1348_p11), [#allocation3], 32   ;;  %p1349_p2 = pmov %p1348_p11 }
  0x68   : > { %s202_s11 = sand.u32 1, %s1116_s16   ;;  %s1245_s20 = sand.u32 1, %s1059_s13  }
  0x69   : > { %1044 = vsyncadd (%p1349_p2), [#allocation3], 4294967264  ;;  %s755_s22 = sshll.u32 %s1245_s20, 8  ;;  %s203_s17 = scalar_lea.sflag [#allocation6], %s202_s11 }
  0x6a   : > { %s1248_s19 = scalar_lea.vmem [#allocation5], %s755_s22  ;;  %p1350_p5 = scmp.ne.s32.totalorder %s1344_s23, 0 }
  0x6c   : > { %1046 = dma.done.wait (%p1350_p5), %s203_s17, 4160  }
  0x6d   : > { %1048 = vsyncadd (%p1350_p5), %s203_s17, 4294963136  ;;  %v889_v0 = vld [vmem:[%s1248_s19 + $0x78] sm:$0xff]   ;;  %v893_v4 = vld [vmem:[%s1248_s19 + $0x70] sm:$0xff]   ;;  %v318_v33 = vlaneseq  ;;  %s756_s23 = sshll.u32 %s1245_s20, 2  ;;  %s757_s27 = sshll.u32 %s1245_s20, 4 }
  0x6e   : > { %v890_v1 = vld [vmem:[%s1248_s19 + $0xf8] sm:$0xff]   ;;  %798 = vmatprep.subr.bf16.mxu0 %v889_v0  ;;  %v894_v5 = vld [vmem:[%s1248_s19 + $0xf0] sm:$0xff]   ;;  %v897_v8 = vld [vmem:[%s1248_s19 + $0x68] sm:$0xff]   ;;  %s215_s26 = scalar_lea.vmem [#allocation7], %s756_s23  ;;  %s797_s10 = sshll.u32 %s1116_s16, 8 }
  0x6f   : > { %v891_v2 = vld [vmem:[%s1248_s19 + $0x38] sm:$0xff]   ;;  %816 = vmatprep.subr.bf16.mxu1 %v890_v1  ;;  %v895_v6 = vld [vmem:[%s1248_s19 + $0x30] sm:$0xff]   ;;  %v898_v9 = vld [vmem:[%s1248_s19 + $0xe8] sm:$0xff]   ;;  %v319_v34 = vshrl.u32 %v318_v33, 7  ;;  %s242_s29 = scalar_lea.vmem [#allocation8], %s757_s27  ;;  %s1292_s6 = scalar_lea.hbm %s1338_s3, %s797_s10 }
  0x70   : > { %v892_v3 = vld [vmem:[%s1248_s19 + $0xb8] sm:$0xff]   ;;  %799 = vmatpush3.bf16.xpose.msra.mxu0 %v891_v2  ;;  %v896_v7 = vld [vmem:[%s1248_s19 + $0xb0] sm:$0xff]   ;;  %v899_v10 = vld [vmem:[%s1248_s19 + $0x28] sm:$0xff]   ;;  %s637_s30 = sshll.u32 %s242_s29, 4  ;;  %s623_s16 = scalar_lea.sflag [#allocation4], %s1245_s20  ;;  %s1294_s30 = int_to_ptr.vmem [resolvable:$true] %s637_s30 }
  0x71   : > { %817 = vmatpush3.bf16.xpose.msra.mxu1 %v892_v3  ;;  %800 = vmatprep.subr.bf16.mxu0 %v893_v4  ;;  %v900_v11 = vld [vmem:[%s1248_s19 + $0xa8] sm:$0xff]   ;;  %v901_v12 = vld [vmem:[%s1248_s19 + $0x60] sm:$0xff]   ;;  %v905_v16 = vld [vmem:[%s1248_s19 + $0x58] sm:$0xff]   ;;  %v320_v35 = vsub.s32 0, %v319_v34  ;;  %v324_v36 = vsub.s32 1, %v319_v34  ;;  %v328_v38 = vsub.s32 2, %v319_v34 }
  0x72   : > { %818 = vmatprep.subr.bf16.mxu1 %v894_v5  ;;  %v902_v13 = vld [vmem:[%s1248_s19 + $0xe0] sm:$0xff]   ;;  %v906_v17 = vld [vmem:[%s1248_s19 + $0xd8] sm:$0xff]   ;;  %v909_v21 = vld [vmem:[%s1248_s19 + $0x50] sm:$0xff]   ;;  %v332_v39 = vsub.s32 3, %v319_v34  ;;  %s999_s7 = scalar_lea.vmem %s1294_s30, 256  ;;  %p1351_p7 = scmp.ne.s32.totalorder %s1345_s24, 0 }
  0x73   : > { %v903_v14 = vld [vmem:[%s1248_s19 + $0x20] sm:$0xff]   ;;  %v907_v18 = vld [vmem:[%s1248_s19 + $0x18] sm:$0xff]   ;;  %v910_v22 = vld [vmem:[%s1248_s19 + $0xd0] sm:$0xff]   ;;  %p1000_p13 = scmp.ne.s32.totalorder %s1294_s30, %s999_s7  ;;  %s1074_s5 = smov [#allocation8]  }
  0x74   : > { %v904_v15 = vld [vmem:[%s1248_s19 + $0xa0] sm:$0xff]   ;;  %v251_v19 = vld [vmem:[#allocation2] sm:$0x3]  ;;  %v911_v23 = vld [vmem:[%s1248_s19 + $0x10] sm:$0xff]   ;;  %s1003_s8 = sshll.u32 %s1074_s5, 4  ;;  %s1004_s8 = int_to_ptr.vmem [resolvable:$false] %s1003_s8 }
  0x75   : > { %v908_v20 = vld [vmem:[%s1248_s19 + $0x98] sm:$0xff]   ;;  %814 = vmatprep.mubr.bf16.mxu0 %v251_v19  ;;  %832 = vmatprep.mubr.bf16.mxu1 %v251_v19  ;;  %v912_v24 = vld [vmem:[%s1248_s19 + $0x90] sm:$0xff]   ;;  %v913_v25 = vld [vmem:[%s1248_s19 + $0x48] sm:$0xff]   ;;  %p1001_p3 = pnand %p1000_p13, %p1351_p7  ;;  %s1005_s9 = scalar_lea.vmem %s1004_s8, 512 }
  0x76   : > { %v914_v26 = vld [vmem:[%s1248_s19 + $0xc8] sm:$0xff]   ;;  %v917_v29 = vld [vmem:[%s1248_s19 + $0x40] sm:$0xff]   ;;  %p1006_p9 = scmp.lt.s32.totalorder %s1294_s30, %s1004_s8  ;;  %p1007_p6 = scmp.lt.s32.totalorder %s1005_s9, %s999_s7 }
  0x77   : > { %v915_v27 = vld [vmem:[%s1248_s19 + $0x8] sm:$0xff]   ;;  %v918_v30 = vld [vmem:[%s1248_s19 + $0xc0] sm:$0xff]   ;;  %p1002_p8 = pneg %p1001_p3 }
  0x78   : > { %801 = vmatpush3.bf16.xpose.msra.mxu0 %v895_v6  ;;  %v916_v28 = vld [vmem:[%s1248_s19 + $0x88] sm:$0xff]   ;;  %v919_v31 = vld [vmem:[%s1248_s19] sm:$0xff]   ;;  %p1008_p12 = por %p1007_p6, %p1006_p9 }
  0x79   : > { %819 = vmatpush3.bf16.xpose.msra.mxu1 %v896_v7  ;;  %802 = vmatprep.subr.bf16.mxu0 %v897_v8  ;;  %v920_v32 = vld [vmem:[%s1248_s19 + $0x80] sm:$0xff]  }
  0x7a   : > { %820 = vmatprep.subr.bf16.mxu1 %v898_v9  ;;  %v316_v37 = vld [vmem:[%s215_s26] sm:$0xf]  ;;  %p1009_p1 = pnand %p1008_p12, %p1002_p8 }
  0x7b   : > { %v321_v40 = vrot.slane %v316_v37, %v320_v35  ;;  %v325_v41 = vrot.slane %v316_v37, %v324_v36  ;;  %v329_v43 = vrot.slane %v316_v37, %v328_v38  ;;  %v333_v44 = vrot.slane %v316_v37, %v332_v39 }
  0x80   : > { %803 = vmatpush3.bf16.xpose.msra.mxu0 %v899_v10 }
  0x81   : > { %821 = vmatpush3.bf16.xpose.msra.mxu1 %v900_v11  ;;  %804 = vmatprep.subr.bf16.mxu0 %v901_v12 }
  0x82   : > { %822 = vmatprep.subr.bf16.mxu1 %v902_v13 }
  0x88   : > { %805 = vmatpush3.bf16.xpose.msra.mxu0 %v903_v14 }
  0x89   : > { %823 = vmatpush3.bf16.xpose.msra.mxu1 %v904_v15  ;;  %806 = vmatprep.subr.bf16.mxu0 %v905_v16 }
  0x8a   : > { %824 = vmatprep.subr.bf16.mxu1 %v906_v17 }
  0x90   : > { %807 = vmatpush3.bf16.xpose.msra.mxu0 %v907_v18 }
  0x91   : > { %825 = vmatpush3.bf16.xpose.msra.mxu1 %v908_v20  ;;  %808 = vmatprep.subr.bf16.mxu0 %v909_v21 }
  0x92   : > { %826 = vmatprep.subr.bf16.mxu1 %v910_v22 }
  0x98   : > { %809 = vmatpush3.bf16.xpose.msra.mxu0 %v911_v23 }
  0x99   : > { %827 = vmatpush3.bf16.xpose.msra.mxu1 %v912_v24  ;;  %810 = vmatprep.subr.bf16.mxu0 %v913_v25 }
  0x9a   : > { %828 = vmatprep.subr.bf16.mxu1 %v914_v26 }
  0xa0   : > { %811 = vmatpush3.bf16.xpose.msra.mxu0 %v915_v27 }
  0xa1   : > { %829 = vmatpush3.bf16.xpose.msra.mxu1 %v916_v28  ;;  %812 = vmatprep.subr.bf16.mxu0 %v917_v29 }
  0xa2   : > { %830 = vmatprep.subr.bf16.mxu1 %v918_v30 }
  0xa8   : > { %813 = vmatpush3.bf16.xpose.msra.mxu0 %v919_v31 }
  0xa9   : > { %831 = vmatpush3.bf16.xpose.msra.mxu1 %v920_v32 }
  0xaf   : > { %815 = vmatmul.mubr.bf16.vlgmr.msra.gmra.mxu0 %v251_v19 }
  0xb0   : > { %833 = vmatmul.mubr.bf16.vlgmr.msra.gmra.mxu1 %v251_v19 }
 0x16f   : > { %v564_v42 = vpop.f32.mrf.mxu0 }
 0x170   : > { %v605_v45 = vpop.f32.mrf.mxu1  ;;  %v565_v47 = vadd.f32 %v564_v42, %v321_v40 }
 0x171   : > { %v566_v46 = vpop.f32.mrf.mxu0  ;;  %v606_v50 = vadd.f32 %v605_v45, %v329_v43 }
 0x172   : > { %v567_v48 = vadd.f32 %v566_v46, %v325_v41  ;;  %v607_v49 = vpop.f32.mrf.mxu1 }
 0x173   : > { %v608_v51 = vadd.f32 %v607_v49, %v333_v44  ;;  %v568_v52 = vpop.f32.mrf.mxu0 }
 0x174   : > { %v616_v53 = vcombine.low %v565_v47, %v567_v48  ;;  %v609_v54 = vpop.f32.mrf.mxu1 }
 0x175   : > { %v617_v55 = vcombine.low %v606_v50, %v608_v51  ;;  %v569_v56 = vpop.f32.mrf.mxu0 }
 0x176   : > { %620 = vst [vmem:[%s242_s29] sm:$0x77] %v616_v53  ;;  %v610_v57 = vpop.f32.mrf.mxu1 }
 0x177   : > { %621 = vst [vmem:[%s242_s29 + $0x8] sm:$0x77] %v617_v55 }
 0x178   : > { %1012 = shalt.err (!%p1009_p1)
}
 0x179   : > { %s1013_s11 = scalar_lea.hbm %s1292_s6, 256  ;;  %s1017_s17 = scalar_lea.hbm %s1338_s3, 512 }
 0x17a   : > { %p1014_p0 = scmp.ne.s32.totalorder %s1292_s6, %s1013_s11  ;;  %p1018_p11 = scmp.lt.s32.totalorder %s1292_s6, %s1338_s3 }
 0x17b   : > { %p1019_p2 = scmp.lt.s32.totalorder %s1017_s17, %s1013_s11 }
 0x17c   : > { %p1015_p4 = pnand %p1014_p0, %p1351_p7 }
 0x17d   : > { %p1020_p5 = por %p1019_p2, %p1018_p11 }
 0x17e   : > { %p1016_p10 = pneg %p1015_p4 }
 0x180   : > { %p1021_p13 = pnand %p1020_p5, %p1016_p10 }
 0x182   : > { %1024 = shalt.err (!%p1021_p13)
}
 0x183   : > { %841 = dma.vmem_to_hbm [thread:$0]  (%p1351_p7), %s1294_s30, 256, %s1292_s6, %s623_s16  }
 0x184 PF: > { %s649_s26 = sand.u32 1, %s1055_s12   ;;  %p1352_p3 = scmp.ne.s32.totalorder %s1346_s25, 0 }
 0x185   : > { %p1353_p8 = scmp.ge.s32.totalorder %s1067_s15, 2  ;;  %s650_s27 = scalar_lea.sflag [#allocation4], %s649_s26 }
 0x187   : > { %p848_p9 = pnand %p1353_p8, %p1352_p3 }
 0x189   : > { %p849_p6 = pneg %p848_p9 }
 0x18b   : > { %1050 = dma.done.wait (%p849_p6), %s650_s27, 256  }
 0x18c   : > { %1052 = vsyncadd (%p849_p6), %s650_s27, 4294967040  ;;  %p17_p12 = scmp.ge.s32.totalorder %s1120_s18, 4   ;;  %s1354_s12 = smov %s1059_s13 }
 0x18d   : > { %s1355_s13 = smov %s1063_s14  ;;  %s1356_s14 = smov %s1132_s21 }
 0x18e   : > { %s1357_s15 = smov %s1120_s18  ;;  %19 = sbr.rel (!%p17_p12) target bundleno = 6 (0x6), region = 93 }
 0x193   :  { %655 = vsyncpa [#allocation3], 1 }
 0x194   :  { %657 = vsyncpa [#allocation3 + $0x1], 1 }
 0x195   :  { %658 = vsyncpa [#allocation6], 1 }
 0x196   :  { %660 = vsyncpa [#allocation6 + $0x1], 1 }
 0x197   :  { %661 = vsyncpa [#allocation4], 1 }
 0x198   :  { %663 = vsyncpa [#allocation4 + $0x1], 1 }

</bundles_post_ra>
